<compile_context>
chip_gen: v6e
topology: v6e:2x2x1
jax: 0.10.0
libtpu: 0.0.40
codegen_flags: <defaults>
</compile_context>

<pallas_src>
import functools

import jax
import jax.numpy as jnp
from jax.experimental import pallas as pl
from jax.experimental.pallas import tpu as pltpu

LANE = 128
BF16_SUBLANE = 16                      # bf16 packs 16 rows per sublane group
VMEM_TILE_BUDGET = 48 * 1024 * 1024    # headroom under v7x's 64 MiB physical VMEM
VMEM_LIMIT_CAP = 64 * 1024 * 1024      # never ask for more than v7x physical


def _round_up(n, m):
    return (n + m - 1) // m * m


def _pad2(a, rows, cols):
    return jnp.pad(a, ((0, rows - a.shape[0]), (0, cols - a.shape[1])))


# --------------------------------- kernel -----------------------------------

def decoder_kernel(x_ref, w1_ref, w2_ref, w3_ref, w4_ref, w5_ref, b_ref, out_ref,
                   *, widths):
    """One batch tile of the decoder MLP. All feature dims are 128-padded."""
    h4w, h3w, h2w, h1w, fow = widths
    o4 = 0
    o3 = o4 + h4w
    o2 = o3 + h3w
    o1 = o2 + h2w
    oo = o1 + h1w

    def layer(h, w_ref, off, width, relu):
        # bf16 operands on the MXU, f32 accumulation; bias add / ReLU in f32.
        y = jnp.dot(h.astype(jnp.bfloat16), w_ref[...],
                    preferred_element_type=jnp.float32)
        y = y + b_ref[:, off:off + width]          # static, 128-aligned slice
        return jnp.maximum(y, 0.0) if relu else y

    h = layer(x_ref[...], w1_ref, o4, h4w, True)   # latent  -> hidden4
    h = layer(h, w2_ref, o3, h3w, True)            # hidden4 -> hidden3
    h = layer(h, w3_ref, o2, h2w, True)            # hidden3 -> hidden2
    h = layer(h, w4_ref, o1, h1w, True)            # hidden2 -> hidden1
    out = layer(h, w5_ref, oo, fow, False)         # hidden1 -> output (no act)
    out_ref[...] = out.astype(out_ref.dtype)


# ------------------------- one-time parameter prep ---------------------------

def prepare_decoder_params(params):
    """One-time prep (cache and reuse across forward calls):
    pad every feature dim to a multiple of 128 lanes, cast weights to bf16,
    and pack the five biases into a single lane-padded f32 row (one DMA)."""
    w = [params[f"w{i}"] for i in range(1, 6)]     # stored (in, out)
    b = [params[f"b{i}"] for i in range(1, 6)]
    L = w[0].shape[0]
    out_dims = [wi.shape[1] for wi in w]           # H4, H3, H2, H1, F
    Lp = _round_up(L, LANE)
    out_dims_p = [_round_up(d, LANE) for d in out_dims]
    in_dims_p = [Lp] + out_dims_p[:-1]

    weights_p = tuple(
        _pad2(wi, ip, op).astype(jnp.bfloat16)
        for wi, ip, op in zip(w, in_dims_p, out_dims_p))

    bias_packed = jnp.concatenate(
        [jnp.pad(bi.reshape(1, -1).astype(jnp.float32),
                 ((0, 0), (0, op - bi.shape[0])))
         for bi, op in zip(b, out_dims_p)], axis=1)

    return {
        "weights": weights_p,           # bf16, lane-padded, (in, out)
        "bias_packed": bias_packed,     # f32, (1, sum of padded widths)
        "latent_dim": L,
        "latent_dim_p": Lp,
        "out_dim": out_dims[-1],
        "widths": tuple(out_dims_p),    # (H4p, H3p, H2p, H1p, Fp)
    }


def _choose_batch_tile(B, Lp, Fp, resident_bytes, batch_tile, out_bytes):
    """16-aligned (bf16 sublanes) batch tile, >=2 grid steps when B allows
    (so v7x's two TensorCores both work), capped by the VMEM budget."""
    tb = min(batch_tile, _round_up(pl.cdiv(B, 2), BF16_SUBLANE))
    tb = max(tb, BF16_SUBLANE)

    def vmem_needed(t):
        # single-buffered residents + double-buffered bf16 x tile + out tile
        return resident_bytes + 2 * t * Lp * 2 + 2 * t * Fp * out_bytes

    while tb > BF16_SUBLANE and vmem_needed(tb) > VMEM_TILE_BUDGET:
        tb -= BF16_SUBLANE
    return tb


# --------------------------------- forward -----------------------------------

def decoder_forward(latent, prepped, *, batch_tile=512, out_dtype=jnp.float32):
    """Run the Decoder forward pass with a batch-tiled Pallas kernel.

    latent  : (B, latent_length) float32
    prepped : output of prepare_decoder_params (call once, reuse)
    returns : (B, output_size) in out_dtype (default float32)
    """
    B, L = latent.shape
    assert L == prepped["latent_dim"]
    w1p, w2p, w3p, w4p, w5p = prepped["weights"]
    bias_packed = prepped["bias_packed"]
    widths = prepped["widths"]
    Lp = prepped["latent_dim_p"]
    H4p, H3p, H2p, H1p, Fp = widths
    F = prepped["out_dim"]

    out_bytes = jnp.dtype(out_dtype).itemsize
    weight_bytes = sum(w.size * w.dtype.itemsize for w in prepped["weights"])
    bias_bytes = bias_packed.size * 4
    resident_bytes = weight_bytes + bias_bytes

    tb = _choose_batch_tile(B, Lp, Fp, resident_bytes, batch_tile, out_bytes)
    Bp = _round_up(B, tb)
    grid = (Bp // tb,)

    # Per-call work is only this: pad+cast the latent (weights were prepped once).
    x_p = jnp.pad(latent, ((0, Bp - B), (0, Lp - L))).astype(jnp.bfloat16)

    # Worst-case VMEM (everything double-buffered) + headroom, capped at 64 MiB:
    # raises v5e's 16 MiB / v6e-v7x's 32 MiB scoped defaults without exceeding
    # v7x physical VMEM.
    vmem_worst = 2 * (resident_bytes + tb * Lp * 2 + tb * Fp * out_bytes)
    vmem_limit = int(min(VMEM_LIMIT_CAP,
                         max(32 * 1024 * 1024, vmem_worst + (4 << 20))))

    flops = 2 * Bp * (Lp * H4p + H4p * H3p + H3p * H2p + H2p * H1p + H1p * Fp)
    bytes_accessed = x_p.size * 2 + weight_bytes + bias_bytes + Bp * Fp * out_bytes

    const_map = lambda i: (0, 0)

    def build(single_buffer_residents):
        if single_buffer_residents:
            # Constant-index blocks are DMA'd once; single-buffering halves
            # their resident VMEM with zero pipeline cost.
            res = lambda shape: pl.BlockSpec(shape, const_map,
                                             pipeline_mode=pl.Buffered(1))
        else:
            res = lambda shape: pl.BlockSpec(shape, const_map)
        in_specs = [
            pl.BlockSpec((tb, Lp), lambda i: (i, 0)),    # x: batch-tiled
            res((Lp, H4p)),                              # weights: resident
            res((H4p, H3p)),
            res((H3p, H2p)),
            res((H2p, H1p)),
            res((H1p, Fp)),
            res((1, bias_packed.shape[1])),              # packed biases
        ]
        out_spec = pl.BlockSpec((tb, Fp), lambda i: (i, 0))
        return pl.pallas_call(
            functools.partial(decoder_kernel, widths=widths),
            out_shape=jax.ShapeDtypeStruct((Bp, Fp), out_dtype),
            grid=grid,
            in_specs=in_specs,
            out_specs=out_spec,
            compiler_params=pltpu.CompilerParams(
                dimension_semantics=("parallel",),
                vmem_limit_bytes=vmem_limit),
            cost_estimate=pl.CostEstimate(
                flops=flops, transcendentals=0, bytes_accessed=bytes_accessed),
        )

    try:
        out_padded = build(True)(x_p, w1p, w2p, w3p, w4p, w5p, bias_packed)
    except Exception:
        # Fallback for Pallas versions where pipeline_mode=pl.Buffered(1) on a
        # constant-index BlockSpec is rejected: use default double-buffering.
        out_padded = build(False)(x_p, w1p, w2p, w3p, w4p, w5p, bias_packed)

    return out_padded[:B, :F]


# ----------------------------- references / init -----------------------------

def make_params(key, output_size, h1, h2, h3, h4, latent_length):
    """Synthetic init (shapes match the nn.Module; weights stored (in, out))."""
    dims = [(latent_length, h4), (h4, h3), (h3, h2), (h2, h1), (h1, output_size)]
    ks = jax.random.split(key, 2 * len(dims))
    p = {}
    for n, (fi, fo) in enumerate(dims, start=1):
        wb = (6.0 / fi) ** 0.5
        bb = 1.0 / (fi ** 0.5)
        p[f"w{n}"] = jax.random.uniform(ks[2 * (n - 1)], (fi, fo),
                                        jnp.float32, -wb, wb)
        # nonzero biases to exercise the packed-bias path
        p[f"b{n}"] = jax.random.uniform(ks[2 * (n - 1) + 1], (fo,),
                                        jnp.float32, -bb, bb)
    return p


def reference_forward_f32(latent, p):
    relu = lambda v: jnp.maximum(v, 0.0)
    h = relu(latent @ p["w1"] + p["b1"])
    h = relu(h @ p["w2"] + p["b2"])
    h = relu(h @ p["w3"] + p["b3"])
    h = relu(h @ p["w4"] + p["b4"])
    return h @ p["w5"] + p["b5"]


def reference_forward_bf16(latent, p):
    """Matched-precision reference (bf16 matmul operands, f32 accumulation)."""
    def lin(h, w, b):
        return jnp.dot(h.astype(jnp.bfloat16), w.astype(jnp.bfloat16),
                       preferred_element_type=jnp.float32) + b
    relu = lambda v: jnp.maximum(v, 0.0)
    h = relu(lin(latent, p["w1"], p["b1"]))
    h = relu(lin(h, p["w2"], p["b2"]))
    h = relu(lin(h, p["w3"], p["b3"]))
    h = relu(lin(h, p["w4"], p["b4"]))
    return lin(h, p["w5"], p["b5"])


if __name__ == "__main__":
    # Small shapes consistent with the module's MLP structure.
    B = 8
    output_size, hidden1, hidden2, hidden3, hidden4, latent_length = 32, 32, 24, 16, 16, 8

    key = jax.random.PRNGKey(0)
    kx, kp = jax.random.split(key)
    latent = jax.random.normal(kx, (B, latent_length), jnp.float32)
    params = make_params(kp, output_size, hidden1, hidden2, hidden3, hidden4,
                         latent_length)

    # One-time parameter prep (pad / bf16 cast / bias pack), cached and reused.
    prepped = prepare_decoder_params(params)

    out = decoder_forward(latent, prepped)
    jax.block_until_ready(out)
    assert out.shape == (B, output_size)

    # Second call reuses the prepped params (no per-call weight padding).
    out2 = decoder_forward(latent, prepped)
    jax.block_until_ready(out2)
    assert jnp.allclose(out, out2)

    # Tight check vs matched-precision reference, loose check vs pure-f32 module math.
    ref16 = reference_forward_bf16(latent, params)
    ref32 = reference_forward_f32(latent, params)
    assert jnp.allclose(out, ref16, atol=1e-3, rtol=1e-3)
    assert jnp.allclose(out, ref32, atol=5e-2, rtol=5e-2)

    print("KERNEL_OK")
</pallas_src>

<mosaic_0001>
module attributes {stable_mosaic.version = 11 : i64} {
  func.func @decoder_kernel(%arg0: i32, %arg1: memref<16x128xbf16, #tpu.memory_space<vmem>>, %arg2: memref<128x128xbf16, #tpu.memory_space<vmem>>, %arg3: memref<128x128xbf16, #tpu.memory_space<vmem>>, %arg4: memref<128x128xbf16, #tpu.memory_space<vmem>>, %arg5: memref<128x128xbf16, #tpu.memory_space<vmem>>, %arg6: memref<128x128xbf16, #tpu.memory_space<vmem>>, %arg7: memref<1x640xf32, #tpu.memory_space<vmem>>, %arg8: memref<16x128xf32, #tpu.memory_space<vmem>>) attributes {dimension_semantics = [#tpu.dimension_semantics<parallel>], iteration_bounds = array<i64: 1>, scalar_prefetch = 0 : i64, scratch_operands = 0 : i64, tpu.core_type = #tpu.core_type<tc>, window_params = [{transform_indices = @transform_0, window_bounds = array<i64: 16, 128>}, {pipeline_mode = #tpu.pipeline_mode<synchronous>, transform_indices = @transform_1, window_bounds = array<i64: 128, 128>}, {pipeline_mode = #tpu.pipeline_mode<synchronous>, transform_indices = @transform_2, window_bounds = array<i64: 128, 128>}, {pipeline_mode = #tpu.pipeline_mode<synchronous>, transform_indices = @transform_3, window_bounds = array<i64: 128, 128>}, {pipeline_mode = #tpu.pipeline_mode<synchronous>, transform_indices = @transform_4, window_bounds = array<i64: 128, 128>}, {pipeline_mode = #tpu.pipeline_mode<synchronous>, transform_indices = @transform_5, window_bounds = array<i64: 128, 128>}, {pipeline_mode = #tpu.pipeline_mode<synchronous>, transform_indices = @transform_6, window_bounds = array<i64: 1, 640>}, {transform_indices = @transform_7, window_bounds = array<i64: 16, 128>}]} {
    %c0 = arith.constant 0 : index
    %c0_0 = arith.constant 0 : index
    %0 = vector.load %arg1[%c0, %c0_0] : memref<16x128xbf16, #tpu.memory_space<vmem>>, vector<16x128xbf16>
    %c0_1 = arith.constant 0 : index
    %c0_2 = arith.constant 0 : index
    %1 = vector.load %arg2[%c0_1, %c0_2] : memref<128x128xbf16, #tpu.memory_space<vmem>>, vector<128x128xbf16>
    %cst = arith.constant dense<0.000000e+00> : vector<16x128xf32>
    %2 = tpu.matmul %0, %1, %cst {dimension_numbers = #tpu.dot_dimension_numbers<[1], [0], [0], [1], [0, 0, 1, 1], [], []>} : vector<16x128xbf16>, vector<128x128xbf16>, vector<16x128xf32> -> vector<16x128xf32>
    %c0_3 = arith.constant 0 : index
    %c0_4 = arith.constant 0 : index
    %3 = vector.load %arg7[%c0_3, %c0_4] : memref<1x640xf32, #tpu.memory_space<vmem>>, vector<1x128xf32>
    %4 = vector.broadcast %3 : vector<1x128xf32> to vector<16x128xf32>
    %5 = arith.addf %2, %4 : vector<16x128xf32>
    %cst_5 = arith.constant 0.000000e+00 : f32
    %6 = vector.broadcast %cst_5 : f32 to vector<16x128xf32>
    %7 = arith.maximumf %5, %6 : vector<16x128xf32>
    %8 = arith.truncf %7 : vector<16x128xf32> to vector<16x128xbf16>
    %c0_6 = arith.constant 0 : index
    %c0_7 = arith.constant 0 : index
    %9 = vector.load %arg3[%c0_6, %c0_7] : memref<128x128xbf16, #tpu.memory_space<vmem>>, vector<128x128xbf16>
    %cst_8 = arith.constant dense<0.000000e+00> : vector<16x128xf32>
    %10 = tpu.matmul %8, %9, %cst_8 {dimension_numbers = #tpu.dot_dimension_numbers<[1], [0], [0], [1], [0, 0, 1, 1], [], []>} : vector<16x128xbf16>, vector<128x128xbf16>, vector<16x128xf32> -> vector<16x128xf32>
    %c0_9 = arith.constant 0 : index
    %c128 = arith.constant 128 : index
    %11 = vector.load %arg7[%c0_9, %c128] : memref<1x640xf32, #tpu.memory_space<vmem>>, vector<1x128xf32>
    %12 = vector.broadcast %11 : vector<1x128xf32> to vector<16x128xf32>
    %13 = arith.addf %10, %12 : vector<16x128xf32>
    %cst_10 = arith.constant 0.000000e+00 : f32
    %14 = vector.broadcast %cst_10 : f32 to vector<16x128xf32>
    %15 = arith.maximumf %13, %14 : vector<16x128xf32>
    %16 = arith.truncf %15 : vector<16x128xf32> to vector<16x128xbf16>
    %c0_11 = arith.constant 0 : index
    %c0_12 = arith.constant 0 : index
    %17 = vector.load %arg4[%c0_11, %c0_12] : memref<128x128xbf16, #tpu.memory_space<vmem>>, vector<128x128xbf16>
    %cst_13 = arith.constant dense<0.000000e+00> : vector<16x128xf32>
    %18 = tpu.matmul %16, %17, %cst_13 {dimension_numbers = #tpu.dot_dimension_numbers<[1], [0], [0], [1], [0, 0, 1, 1], [], []>} : vector<16x128xbf16>, vector<128x128xbf16>, vector<16x128xf32> -> vector<16x128xf32>
    %c0_14 = arith.constant 0 : index
    %c256 = arith.constant 256 : index
    %19 = vector.load %arg7[%c0_14, %c256] : memref<1x640xf32, #tpu.memory_space<vmem>>, vector<1x128xf32>
    %20 = vector.broadcast %19 : vector<1x128xf32> to vector<16x128xf32>
    %21 = arith.addf %18, %20 : vector<16x128xf32>
    %cst_15 = arith.constant 0.000000e+00 : f32
    %22 = vector.broadcast %cst_15 : f32 to vector<16x128xf32>
    %23 = arith.maximumf %21, %22 : vector<16x128xf32>
    %24 = arith.truncf %23 : vector<16x128xf32> to vector<16x128xbf16>
    %c0_16 = arith.constant 0 : index
    %c0_17 = arith.constant 0 : index
    %25 = vector.load %arg5[%c0_16, %c0_17] : memref<128x128xbf16, #tpu.memory_space<vmem>>, vector<128x128xbf16>
    %cst_18 = arith.constant dense<0.000000e+00> : vector<16x128xf32>
    %26 = tpu.matmul %24, %25, %cst_18 {dimension_numbers = #tpu.dot_dimension_numbers<[1], [0], [0], [1], [0, 0, 1, 1], [], []>} : vector<16x128xbf16>, vector<128x128xbf16>, vector<16x128xf32> -> vector<16x128xf32>
    %c0_19 = arith.constant 0 : index
    %c384 = arith.constant 384 : index
    %27 = vector.load %arg7[%c0_19, %c384] : memref<1x640xf32, #tpu.memory_space<vmem>>, vector<1x128xf32>
    %28 = vector.broadcast %27 : vector<1x128xf32> to vector<16x128xf32>
    %29 = arith.addf %26, %28 : vector<16x128xf32>
    %cst_20 = arith.constant 0.000000e+00 : f32
    %30 = vector.broadcast %cst_20 : f32 to vector<16x128xf32>
    %31 = arith.maximumf %29, %30 : vector<16x128xf32>
    %32 = arith.truncf %31 : vector<16x128xf32> to vector<16x128xbf16>
    %c0_21 = arith.constant 0 : index
    %c0_22 = arith.constant 0 : index
    %33 = vector.load %arg6[%c0_21, %c0_22] : memref<128x128xbf16, #tpu.memory_space<vmem>>, vector<128x128xbf16>
    %cst_23 = arith.constant dense<0.000000e+00> : vector<16x128xf32>
    %34 = tpu.matmul %32, %33, %cst_23 {dimension_numbers = #tpu.dot_dimension_numbers<[1], [0], [0], [1], [0, 0, 1, 1], [], []>} : vector<16x128xbf16>, vector<128x128xbf16>, vector<16x128xf32> -> vector<16x128xf32>
    %c0_24 = arith.constant 0 : index
    %c512 = arith.constant 512 : index
    %35 = vector.load %arg7[%c0_24, %c512] : memref<1x640xf32, #tpu.memory_space<vmem>>, vector<1x128xf32>
    %36 = vector.broadcast %35 : vector<1x128xf32> to vector<16x128xf32>
    %37 = arith.addf %34, %36 : vector<16x128xf32>
    %c0_25 = arith.constant 0 : index
    %c0_26 = arith.constant 0 : index
    %38 = vector.load %arg8[%c0_25, %c0_26] : memref<16x128xf32, #tpu.memory_space<vmem>>, vector<16x128xf32>
    tpu.vector_store %arg8[%c0_25, %c0_26], %37 {strides = array<i32>} : memref<16x128xf32, #tpu.memory_space<vmem>>, vector<16x128xf32>,
    return
  }
  func.func @transform_0(%arg0: i32) -> (i32, i32) {
    %c0_i32 = arith.constant 0 : i32
    %c0_i32_0 = arith.constant 0 : i32
    return %arg0, %c0_i32 : i32, i32
  }
  func.func @transform_1(%arg0: i32) -> (i32, i32) {
    %c0_i32 = arith.constant 0 : i32
    %c0_i32_0 = arith.constant 0 : i32
    %c0_i32_1 = arith.constant 0 : i32
    return %c0_i32, %c0_i32_0 : i32, i32
  }
  func.func @transform_2(%arg0: i32) -> (i32, i32) {
    %c0_i32 = arith.constant 0 : i32
    %c0_i32_0 = arith.constant 0 : i32
    %c0_i32_1 = arith.constant 0 : i32
    return %c0_i32, %c0_i32_0 : i32, i32
  }
  func.func @transform_3(%arg0: i32) -> (i32, i32) {
    %c0_i32 = arith.constant 0 : i32
    %c0_i32_0 = arith.constant 0 : i32
    %c0_i32_1 = arith.constant 0 : i32
    return %c0_i32, %c0_i32_0 : i32, i32
  }
  func.func @transform_4(%arg0: i32) -> (i32, i32) {
    %c0_i32 = arith.constant 0 : i32
    %c0_i32_0 = arith.constant 0 : i32
    %c0_i32_1 = arith.constant 0 : i32
    return %c0_i32, %c0_i32_0 : i32, i32
  }
  func.func @transform_5(%arg0: i32) -> (i32, i32) {
    %c0_i32 = arith.constant 0 : i32
    %c0_i32_0 = arith.constant 0 : i32
    %c0_i32_1 = arith.constant 0 : i32
    return %c0_i32, %c0_i32_0 : i32, i32
  }
  func.func @transform_6(%arg0: i32) -> (i32, i32) {
    %c0_i32 = arith.constant 0 : i32
    %c0_i32_0 = arith.constant 0 : i32
    %c0_i32_1 = arith.constant 0 : i32
    return %c0_i32, %c0_i32_0 : i32, i32
  }
  func.func @transform_7(%arg0: i32) -> (i32, i32) {
    %c0_i32 = arith.constant 0 : i32
    %c0_i32_0 = arith.constant 0 : i32
    return %arg0, %c0_i32 : i32, i32
  }
}

module attributes {stable_mosaic.version = 11 : i64} {
  func.func @decoder_kernel(%arg0: i32, %arg1: memref<16x128xbf16, #tpu.memory_space<vmem>>, %arg2: memref<128x128xbf16, #tpu.memory_space<vmem>>, %arg3: memref<128x128xbf16, #tpu.memory_space<vmem>>, %arg4: memref<128x128xbf16, #tpu.memory_space<vmem>>, %arg5: memref<128x128xbf16, #tpu.memory_space<vmem>>, %arg6: memref<128x128xbf16, #tpu.memory_space<vmem>>, %arg7: memref<1x640xf32, #tpu.memory_space<vmem>>, %arg8: memref<16x128xf32, #tpu.memory_space<vmem>>) attributes {dimension_semantics = [#tpu.dimension_semantics<parallel>], iteration_bounds = array<i64: 1>, scalar_prefetch = 0 : i64, scratch_operands = 0 : i64, tpu.core_type = #tpu.core_type<tc>, window_params = [{transform_indices = @transform_0, window_bounds = array<i64: 16, 128>}, {pipeline_mode = #tpu.pipeline_mode<synchronous>, transform_indices = @transform_1, window_bounds = array<i64: 128, 128>}, {pipeline_mode = #tpu.pipeline_mode<synchronous>, transform_indices = @transform_2, window_bounds = array<i64: 128, 128>}, {pipeline_mode = #tpu.pipeline_mode<synchronous>, transform_indices = @transform_3, window_bounds = array<i64: 128, 128>}, {pipeline_mode = #tpu.pipeline_mode<synchronous>, transform_indices = @transform_4, window_bounds = array<i64: 128, 128>}, {pipeline_mode = #tpu.pipeline_mode<synchronous>, transform_indices = @transform_5, window_bounds = array<i64: 128, 128>}, {pipeline_mode = #tpu.pipeline_mode<synchronous>, transform_indices = @transform_6, window_bounds = array<i64: 1, 640>}, {transform_indices = @transform_7, window_bounds = array<i64: 16, 128>}]} {
    %c0 = arith.constant 0 : index
    %c0_0 = arith.constant 0 : index
    %0 = vector.load %arg1[%c0, %c0_0] : memref<16x128xbf16, #tpu.memory_space<vmem>>, vector<16x128xbf16>
    %c0_1 = arith.constant 0 : index
    %c0_2 = arith.constant 0 : index
    %1 = vector.load %arg2[%c0_1, %c0_2] : memref<128x128xbf16, #tpu.memory_space<vmem>>, vector<128x128xbf16>
    %cst = arith.constant dense<0.000000e+00> : vector<16x128xf32>
    %2 = tpu.matmul %0, %1, %cst {dimension_numbers = #tpu.dot_dimension_numbers<[1], [0], [0], [1], [0, 0, 1, 1], [], []>} : vector<16x128xbf16>, vector<128x128xbf16>, vector<16x128xf32> -> vector<16x128xf32>
    %c0_3 = arith.constant 0 : index
    %c0_4 = arith.constant 0 : index
    %3 = vector.load %arg7[%c0_3, %c0_4] : memref<1x640xf32, #tpu.memory_space<vmem>>, vector<1x128xf32>
    %4 = vector.broadcast %3 : vector<1x128xf32> to vector<16x128xf32>
    %5 = arith.addf %2, %4 : vector<16x128xf32>
    %cst_5 = arith.constant 0.000000e+00 : f32
    %6 = vector.broadcast %cst_5 : f32 to vector<16x128xf32>
    %7 = arith.maximumf %5, %6 : vector<16x128xf32>
    %8 = arith.truncf %7 : vector<16x128xf32> to vector<16x128xbf16>
    %c0_6 = arith.constant 0 : index
    %c0_7 = arith.constant 0 : index
    %9 = vector.load %arg3[%c0_6, %c0_7] : memref<128x128xbf16, #tpu.memory_space<vmem>>, vector<128x128xbf16>
    %cst_8 = arith.constant dense<0.000000e+00> : vector<16x128xf32>
    %10 = tpu.matmul %8, %9, %cst_8 {dimension_numbers = #tpu.dot_dimension_numbers<[1], [0], [0], [1], [0, 0, 1, 1], [], []>} : vector<16x128xbf16>, vector<128x128xbf16>, vector<16x128xf32> -> vector<16x128xf32>
    %c0_9 = arith.constant 0 : index
    %c128 = arith.constant 128 : index
    %11 = vector.load %arg7[%c0_9, %c128] : memref<1x640xf32, #tpu.memory_space<vmem>>, vector<1x128xf32>
    %12 = vector.broadcast %11 : vector<1x128xf32> to vector<16x128xf32>
    %13 = arith.addf %10, %12 : vector<16x128xf32>
    %cst_10 = arith.constant 0.000000e+00 : f32
    %14 = vector.broadcast %cst_10 : f32 to vector<16x128xf32>
    %15 = arith.maximumf %13, %14 : vector<16x128xf32>
    %16 = arith.truncf %15 : vector<16x128xf32> to vector<16x128xbf16>
    %c0_11 = arith.constant 0 : index
    %c0_12 = arith.constant 0 : index
    %17 = vector.load %arg4[%c0_11, %c0_12] : memref<128x128xbf16, #tpu.memory_space<vmem>>, vector<128x128xbf16>
    %cst_13 = arith.constant dense<0.000000e+00> : vector<16x128xf32>
    %18 = tpu.matmul %16, %17, %cst_13 {dimension_numbers = #tpu.dot_dimension_numbers<[1], [0], [0], [1], [0, 0, 1, 1], [], []>} : vector<16x128xbf16>, vector<128x128xbf16>, vector<16x128xf32> -> vector<16x128xf32>
    %c0_14 = arith.constant 0 : index
    %c256 = arith.constant 256 : index
    %19 = vector.load %arg7[%c0_14, %c256] : memref<1x640xf32, #tpu.memory_space<vmem>>, vector<1x128xf32>
    %20 = vector.broadcast %19 : vector<1x128xf32> to vector<16x128xf32>
    %21 = arith.addf %18, %20 : vector<16x128xf32>
    %cst_15 = arith.constant 0.000000e+00 : f32
    %22 = vector.broadcast %cst_15 : f32 to vector<16x128xf32>
    %23 = arith.maximumf %21, %22 : vector<16x128xf32>
    %24 = arith.truncf %23 : vector<16x128xf32> to vector<16x128xbf16>
    %c0_16 = arith.constant 0 : index
    %c0_17 = arith.constant 0 : index
    %25 = vector.load %arg5[%c0_16, %c0_17] : memref<128x128xbf16, #tpu.memory_space<vmem>>, vector<128x128xbf16>
    %cst_18 = arith.constant dense<0.000000e+00> : vector<16x128xf32>
    %26 = tpu.matmul %24, %25, %cst_18 {dimension_numbers = #tpu.dot_dimension_numbers<[1], [0], [0], [1], [0, 0, 1, 1], [], []>} : vector<16x128xbf16>, vector<128x128xbf16>, vector<16x128xf32> -> vector<16x128xf32>
    %c0_19 = arith.constant 0 : index
    %c384 = arith.constant 384 : index
    %27 = vector.load %arg7[%c0_19, %c384] : memref<1x640xf32, #tpu.memory_space<vmem>>, vector<1x128xf32>
    %28 = vector.broadcast %27 : vector<1x128xf32> to vector<16x128xf32>
    %29 = arith.addf %26, %28 : vector<16x128xf32>
    %cst_20 = arith.constant 0.000000e+00 : f32
    %30 = vector.broadcast %cst_20 : f32 to vector<16x128xf32>
    %31 = arith.maximumf %29, %30 : vector<16x128xf32>
    %32 = arith.truncf %31 : vector<16x128xf32> to vector<16x128xbf16>
    %c0_21 = arith.constant 0 : index
    %c0_22 = arith.constant 0 : index
    %33 = vector.load %arg6[%c0_21, %c0_22] : memref<128x128xbf16, #tpu.memory_space<vmem>>, vector<128x128xbf16>
    %cst_23 = arith.constant dense<0.000000e+00> : vector<16x128xf32>
    %34 = tpu.matmul %32, %33, %cst_23 {dimension_numbers = #tpu.dot_dimension_numbers<[1], [0], [0], [1], [0, 0, 1, 1], [], []>} : vector<16x128xbf16>, vector<128x128xbf16>, vector<16x128xf32> -> vector<16x128xf32>
    %c0_24 = arith.constant 0 : index
    %c512 = arith.constant 512 : index
    %35 = vector.load %arg7[%c0_24, %c512] : memref<1x640xf32, #tpu.memory_space<vmem>>, vector<1x128xf32>
    %36 = vector.broadcast %35 : vector<1x128xf32> to vector<16x128xf32>
    %37 = arith.addf %34, %36 : vector<16x128xf32>
    %c0_25 = arith.constant 0 : index
    %c0_26 = arith.constant 0 : index
    %38 = vector.load %arg8[%c0_25, %c0_26] : memref<16x128xf32, #tpu.memory_space<vmem>>, vector<16x128xf32>
    tpu.vector_store %arg8[%c0_25, %c0_26], %37 {strides = array<i32>} : memref<16x128xf32, #tpu.memory_space<vmem>>, vector<16x128xf32>,
    return
  }
  func.func @transform_0(%arg0: i32) -> (i32, i32) {
    %c0_i32 = arith.constant 0 : i32
    %c0_i32_0 = arith.constant 0 : i32
    return %arg0, %c0_i32 : i32, i32
  }
  func.func @transform_1(%arg0: i32) -> (i32, i32) {
    %c0_i32 = arith.constant 0 : i32
    %c0_i32_0 = arith.constant 0 : i32
    %c0_i32_1 = arith.constant 0 : i32
    return %c0_i32, %c0_i32_0 : i32, i32
  }
  func.func @transform_2(%arg0: i32) -> (i32, i32) {
    %c0_i32 = arith.constant 0 : i32
    %c0_i32_0 = arith.constant 0 : i32
    %c0_i32_1 = arith.constant 0 : i32
    return %c0_i32, %c0_i32_0 : i32, i32
  }
  func.func @transform_3(%arg0: i32) -> (i32, i32) {
    %c0_i32 = arith.constant 0 : i32
    %c0_i32_0 = arith.constant 0 : i32
    %c0_i32_1 = arith.constant 0 : i32
    return %c0_i32, %c0_i32_0 : i32, i32
  }
  func.func @transform_4(%arg0: i32) -> (i32, i32) {
    %c0_i32 = arith.constant 0 : i32
    %c0_i32_0 = arith.constant 0 : i32
    %c0_i32_1 = arith.constant 0 : i32
    return %c0_i32, %c0_i32_0 : i32, i32
  }
  func.func @transform_5(%arg0: i32) -> (i32, i32) {
    %c0_i32 = arith.constant 0 : i32
    %c0_i32_0 = arith.constant 0 : i32
    %c0_i32_1 = arith.constant 0 : i32
    return %c0_i32, %c0_i32_0 : i32, i32
  }
  func.func @transform_6(%arg0: i32) -> (i32, i32) {
    %c0_i32 = arith.constant 0 : i32
    %c0_i32_0 = arith.constant 0 : i32
    %c0_i32_1 = arith.constant 0 : i32
    return %c0_i32, %c0_i32_0 : i32, i32
  }
  func.func @transform_7(%arg0: i32) -> (i32, i32) {
    %c0_i32 = arith.constant 0 : i32
    %c0_i32_0 = arith.constant 0 : i32
    return %arg0, %c0_i32 : i32, i32
  }
}

</mosaic_0001>

<bundles_post_ra>
// kernel: tpu_custom_call.1
= control target key start
LH: loop header
LB: loop body
LE: loop exit
PB: predicated region body
PF: predicated region fallthrough
CT: control target
= control target key end

     0   :  { %12 = vsyncpa [#allocation3], 0  ;;  %s1264_s0 = inlined_call_operand.hbm [shape: bf16[16,128], index: 0, kind: input, shape index: {}]   ;;  %s1265_s1 = inlined_call_operand.hbm [shape: bf16[128,128], index: 1, kind: input, shape index: {}]   ;;  %s1266_s2 = inlined_call_operand.hbm [shape: bf16[128,128], index: 2, kind: input, shape index: {}]   ;;  %s1267_s3 = inlined_call_operand.hbm [shape: bf16[128,128], index: 3, kind: input, shape index: {}]   ;;  %s1268_s4 = inlined_call_operand.hbm [shape: bf16[128,128], index: 4, kind: input, shape index: {}]   ;;  %s1269_s5 = inlined_call_operand.hbm [shape: bf16[128,128], index: 5, kind: input, shape index: {}]   ;;  %s1270_s6 = inlined_call_operand.vmem [shape: f32[1,640], index: 6, kind: input, shape index: {}]   ;;  %s1271_s7 = inlined_call_operand.hbm [shape: f32[16,128], index: 7, kind: output, shape index: {}]  }
   0x1   :  { %13 = vsyncpa [#allocation6], 0 }
   0x2   :  { %14 = vsyncpa [#allocation9], 0 }
   0x3   :  { %15 = vsyncpa [#allocation12], 0 }
   0x4   :  { %16 = vsyncpa [#allocation4], 0  ;;  %s1107_s24 = smov [#allocation5]   ;;  %s1108_s26 = smov [#allocation8]  }
   0x5   :  { %s34_s25 = sshll.u32 %s1107_s24, 4  ;;  %s58_s27 = sshll.u32 %s1108_s26, 4  ;;  %s35_s25 = int_to_ptr.vmem [resolvable:$true] %s34_s25  ;;  %s59_s27 = int_to_ptr.vmem [resolvable:$true] %s58_s27 }
   0x6   :  { %s965_s28 = scalar_lea.vmem %s35_s25, 1024  ;;  %p970_p1 = scmp.lt.s32.totalorder %s35_s25, %s35_s25 }
   0x7   :  { %p966_p0 = scmp.ne.s32.totalorder %s35_s25, %s965_s28  ;;  %p971_p2 = scmp.lt.s32.totalorder %s965_s28, %s965_s28 }
   0x9   :  { %p972_p3 = por %p971_p2, %p970_p1 }
   0xb   :  { %p973_p4 = pnand %p972_p3, %p966_p0 }
   0xd   :  { %976 = shalt.err (!%p973_p4)
}
   0xe   :  { %s1109_s29 = smov 64   ;;  %s1110_s30 = smov 4  }
   0xf   :  { %40 = dma.hbm_to_vmem [thread:$0]  %s1265_s1, 1024, %s35_s25, [#allocation6], %s1109_s29, %s1109_s29, %s1110_s30  }
  0x10   :  { %s985_s10 = scalar_lea.vmem %s59_s27, 1024  ;;  %p990_p6 = scmp.lt.s32.totalorder %s59_s27, %s59_s27 }
  0x11   :  { %p986_p5 = scmp.ne.s32.totalorder %s59_s27, %s985_s10  ;;  %p991_p7 = scmp.lt.s32.totalorder %s985_s10, %s985_s10 }
  0x13   :  { %p992_p8 = por %p991_p7, %p990_p6 }
  0x15   :  { %p993_p9 = pnand %p992_p8, %p986_p5 }
  0x17   :  { %996 = shalt.err (!%p993_p9)
}
  0x18   :  { %64 = dma.hbm_to_vmem [thread:$0]  %s1267_s3, 1024, %s59_s27, [#allocation9], %s1109_s29, %s1109_s29, %s1110_s30  }
  0x19   :  { %s1111_s13 = smov [#allocation2]   ;;  %s1112_s15 = smov [#allocation7]  }
  0x1a   :  { %s22_s14 = sshll.u32 %s1111_s13, 4  ;;  %s46_s16 = sshll.u32 %s1112_s15, 4  ;;  %s23_s14 = int_to_ptr.vmem [resolvable:$true] %s22_s14  ;;  %s47_s16 = int_to_ptr.vmem [resolvable:$true] %s46_s16 }
  0x1b   :  { %s1005_s1 = scalar_lea.vmem %s23_s14, 128  ;;  %p1010_p11 = scmp.lt.s32.totalorder %s23_s14, %s23_s14 }
  0x1c   :  { %p1006_p10 = scmp.ne.s32.totalorder %s23_s14, %s1005_s1  ;;  %p1011_p12 = scmp.lt.s32.totalorder %s1005_s1, %s1005_s1 }
  0x1e   :  { %p1012_p13 = por %p1011_p12, %p1010_p11 }
  0x20   :  { %p1013_p0 = pnand %p1012_p13, %p1006_p10 }
  0x22   :  { %1016 = shalt.err (!%p1013_p0)
}
  0x23   :  { %28 = dma.hbm_to_vmem [thread:$0]  %s1264_s0, 128, %s23_s14, [#allocation3], %s1109_s29, %s1109_s29, %s1110_s30  }
  0x24   :  { %s1025_s3 = scalar_lea.vmem %s47_s16, 1024  ;;  %p1030_p2 = scmp.lt.s32.totalorder %s47_s16, %s47_s16 }
  0x25   :  { %p1026_p1 = scmp.ne.s32.totalorder %s47_s16, %s1025_s3  ;;  %p1031_p3 = scmp.lt.s32.totalorder %s1025_s3, %s1025_s3 }
  0x27   :  { %p1032_p4 = por %p1031_p3, %p1030_p2 }
  0x29   :  { %p1033_p5 = pnand %p1032_p4, %p1026_p1 }
  0x2b   :  { %1036 = shalt.err (!%p1033_p5)
}
  0x2c   :  { %52 = dma.hbm_to_vmem [thread:$0]  %s1266_s2, 1024, %s47_s16, [#allocation6], %s1109_s29, %s1109_s29, %s1110_s30  }
  0x2d   :  { %s1113_s21 = smov [#allocation10]   ;;  %s1114_s23 = smov [#allocation11]  }
  0x2e   :  { %s70_s22 = sshll.u32 %s1113_s21, 4  ;;  %s82_s24 = sshll.u32 %s1114_s23, 4  ;;  %s71_s22 = int_to_ptr.vmem [resolvable:$true] %s70_s22  ;;  %s83_s24 = int_to_ptr.vmem [resolvable:$true] %s82_s24 }
  0x2f   :  { %s1045_s0 = scalar_lea.vmem %s71_s22, 1024  ;;  %p1050_p7 = scmp.lt.s32.totalorder %s71_s22, %s71_s22 }
  0x30   :  { %p1046_p6 = scmp.ne.s32.totalorder %s71_s22, %s1045_s0  ;;  %p1051_p8 = scmp.lt.s32.totalorder %s1045_s0, %s1045_s0 }
  0x32   :  { %p1052_p9 = por %p1051_p8, %p1050_p7 }
  0x34   :  { %p1053_p10 = pnand %p1052_p9, %p1046_p6 }
  0x36   :  { %1056 = shalt.err (!%p1053_p10)
}
  0x37   :  { %76 = dma.hbm_to_vmem [thread:$0]  %s1268_s4, 1024, %s71_s22, [#allocation9], %s1109_s29, %s1109_s29, %s1110_s30  }
  0x38   :  { %s1065_s2 = scalar_lea.vmem %s83_s24, 1024  ;;  %p1070_p12 = scmp.lt.s32.totalorder %s83_s24, %s83_s24 }
  0x39   :  { %p1066_p11 = scmp.ne.s32.totalorder %s83_s24, %s1065_s2  ;;  %p1071_p13 = scmp.lt.s32.totalorder %s1065_s2, %s1065_s2 }
  0x3b   :  { %p1072_p0 = por %p1071_p13, %p1070_p12 }
  0x3d   :  { %p1073_p1 = pnand %p1072_p0, %p1066_p11 }
  0x3f   :  { %1076 = shalt.err (!%p1073_p1)
}
  0x40   :  { %88 = dma.hbm_to_vmem [thread:$0]  %s1269_s5, 1024, %s83_s24, [#allocation12], %s1109_s29, %s1109_s29, %s1110_s30  }
  0x41   :  { %1097 = dma.done.wait [#allocation3], 128  }
  0x42   :  { %1098 = vsyncadd [#allocation3], 4294967168 }
  0x43   :  { %1099 = dma.done.wait [#allocation6], 2048  }
  0x44   :  { %1100 = vsyncadd [#allocation6], 4294965248 }
  0x45   :  { %1101 = dma.done.wait [#allocation9], 2048  }
  0x46   :  { %1102 = vsyncadd [#allocation9], 4294965248 }
  0x47   :  { %1103 = dma.done.wait [#allocation12], 1024  }
  0x48   :  { %1104 = vsyncadd [#allocation12], 4294966272  ;;  %v1115_v0 = vmov 0.0   ;;  %vm1116_vm0 = vmmov 0   ;;  %v916_v1 = vld [vmem:[#allocation5 + $0x38] sm:$0xff]   ;;  %v917_v2 = vld [vmem:[#allocation5 + $0x30] sm:$0xff]  }
  0x49   :  { %803 = vmatprep.subr.bf16.mxu0 %v1115_v0  ;;  %819 = vmatprep.mubr.msk.bf16.mxu0 %vm1116_vm0, %v1115_v0  ;;  %v918_v3 = vld [vmem:[#allocation5 + $0x28] sm:$0xff]   ;;  %v925_v4 = vld [vmem:[#allocation7 + $0x38] sm:$0xff]   ;;  %v919_v5 = vld [vmem:[#allocation5 + $0x20] sm:$0xff]   ;;  %s1117_s14 = smov [#allocation13]  }
  0x4a   :  { %823 = vmatprep.subr.bf16.mxu1 %v1115_v0  ;;  %839 = vmatprep.mubr.msk.bf16.mxu1 %vm1116_vm0, %v1115_v0  ;;  %v926_v6 = vld [vmem:[#allocation7 + $0x30] sm:$0xff]   ;;  %v920_v7 = vld [vmem:[#allocation5 + $0x18] sm:$0xff]   ;;  %v927_v8 = vld [vmem:[#allocation7 + $0x28] sm:$0xff]   ;;  %s697_s15 = sshll.u32 %s1117_s14, 4  ;;  %s698_s15 = int_to_ptr.vmem [resolvable:$true] %s697_s15 }
  0x4b   :  { %804 = vmatpush3.bf16.msra.mxu0 %v916_v1  ;;  %824 = vmatpush3.bf16.msra.mxu1 %v925_v4  ;;  %v921_v9 = vld [vmem:[#allocation5 + $0x10] sm:$0xff]   ;;  %v928_v10 = vld [vmem:[#allocation7 + $0x20] sm:$0xff]   ;;  %v922_v11 = vld [vmem:[#allocation5 + $0x8] sm:$0xff]   ;;  %s1077_s16 = scalar_lea.vmem %s698_s15, 256  ;;  %p1082_p3 = scmp.lt.s32.totalorder %s698_s15, %s698_s15 }
  0x4c   :  { %805 = vmatprep.subr.bf16.mxu0 %v1115_v0  ;;  %825 = vmatprep.subr.bf16.mxu1 %v1115_v0  ;;  %v929_v12 = vld [vmem:[#allocation7 + $0x18] sm:$0xff]   ;;  %v923_v13 = vld [vmem:[#allocation5] sm:$0xff]   ;;  %v930_v15 = vld [vmem:[#allocation7 + $0x10] sm:$0xff]   ;;  %p1078_p2 = scmp.ne.s32.totalorder %s698_s15, %s1077_s16  ;;  %p1083_p4 = scmp.lt.s32.totalorder %s1077_s16, %s1077_s16 }
  0x4d   :  { %v924_v14 = vld [vmem:[#allocation2] sm:$0xff]   ;;  %v931_v16 = vld [vmem:[#allocation7 + $0x8] sm:$0xff]   ;;  %v932_v17 = vld [vmem:[#allocation7] sm:$0xff]  }
  0x4e   :  { %v933_v18 = vld [vmem:[#allocation8 + $0x38] sm:$0xff]   ;;  %v934_v19 = vld [vmem:[#allocation8 + $0x30] sm:$0xff]   ;;  %v935_v20 = vld [vmem:[#allocation8 + $0x28] sm:$0xff]   ;;  %p1084_p5 = por %p1083_p4, %p1082_p3 }
  0x4f   :  { %806 = vmatpush3.bf16.msra.mxu0 %v917_v2  ;;  %826 = vmatpush3.bf16.msra.mxu1 %v926_v6  ;;  %v936_v21 = vld [vmem:[#allocation8 + $0x20] sm:$0xff]   ;;  %v937_v22 = vld [vmem:[#allocation8 + $0x18] sm:$0xff]   ;;  %v938_v33 = vld [vmem:[#allocation8 + $0x10] sm:$0xff]  }
  0x50   :  { %807 = vmatprep.subr.bf16.mxu0 %v1115_v0  ;;  %827 = vmatprep.subr.bf16.mxu1 %v1115_v0  ;;  %v712_v23 = vld [vmem:[%s1270_s6] ss:$0 sm:$0xff]  ;;  %v939_v34 = vld [vmem:[#allocation8 + $0x8] sm:$0xff]   ;;  %v940_v35 = vld [vmem:[#allocation8] sm:$0xff]   ;;  %p1085_p6 = pnand %p1084_p5, %p1078_p2 }
  0x51   :  { %v941_v36 = vld [vmem:[#allocation10 + $0x38] sm:$0xff]   ;;  %v942_v37 = vld [vmem:[#allocation10 + $0x30] sm:$0xff]   ;;  %v943_v38 = vld [vmem:[#allocation10 + $0x28] sm:$0xff]  }
  0x52   :  { %v944_v39 = vld [vmem:[#allocation10 + $0x20] sm:$0xff]   ;;  %v945_v40 = vld [vmem:[#allocation10 + $0x18] sm:$0xff]   ;;  %v946_v51 = vld [vmem:[#allocation10 + $0x10] sm:$0xff]  }
  0x53   :  { %808 = vmatpush3.bf16.msra.mxu0 %v918_v3  ;;  %828 = vmatpush3.bf16.msra.mxu1 %v927_v8  ;;  %v722_v41 = vld [vmem:[%s1270_s6 + $0x1] ss:$0 sm:$0xff]  ;;  %v947_v52 = vld [vmem:[#allocation10 + $0x8] sm:$0xff]   ;;  %v948_v53 = vld [vmem:[#allocation10] sm:$0xff]  }
  0x54   :  { %809 = vmatprep.subr.bf16.mxu0 %v1115_v0  ;;  %829 = vmatprep.subr.bf16.mxu1 %v1115_v0  ;;  %v949_v54 = vld [vmem:[#allocation11 + $0x38] sm:$0xff]   ;;  %v950_v55 = vld [vmem:[#allocation11 + $0x30] sm:$0xff]   ;;  %v951_v56 = vld [vmem:[#allocation11 + $0x28] sm:$0xff]  }
  0x55   :  { %v952_v57 = vld [vmem:[#allocation11 + $0x20] sm:$0xff]   ;;  %v953_v58 = vld [vmem:[#allocation11 + $0x18] sm:$0xff]   ;;  %v954_v6 = vld [vmem:[#allocation11 + $0x10] sm:$0xff]  }
  0x56   :  { %v731_v59 = vld [vmem:[%s1270_s6 + $0x2] ss:$0 sm:$0xff]  ;;  %v956_v8 = vld [vmem:[#allocation11] sm:$0xff]  }
  0x57   :  { %810 = vmatpush3.bf16.msra.mxu0 %v919_v5  ;;  %830 = vmatpush3.bf16.msra.mxu1 %v928_v10 }
  0x58   :  { %811 = vmatprep.subr.bf16.mxu0 %v1115_v0  ;;  %831 = vmatprep.subr.bf16.mxu1 %v1115_v0 }
  0x5b   :  { %812 = vmatpush3.bf16.msra.mxu0 %v920_v7  ;;  %832 = vmatpush3.bf16.msra.mxu1 %v929_v12  ;;  %v955_v7 = vld [vmem:[#allocation11 + $0x8] sm:$0xff]  }
  0x5c   :  { %813 = vmatprep.subr.bf16.mxu0 %v1115_v0  ;;  %833 = vmatprep.subr.bf16.mxu1 %v1115_v0 }
  0x5f   :  { %814 = vmatpush3.bf16.msra.mxu0 %v921_v9  ;;  %834 = vmatpush3.bf16.msra.mxu1 %v930_v15  ;;  %v740_v9 = vld [vmem:[%s1270_s6 + $0x3] ss:$0 sm:$0xff] }
  0x60   :  { %815 = vmatprep.subr.bf16.mxu0 %v1115_v0  ;;  %835 = vmatprep.subr.bf16.mxu1 %v1115_v0 }
  0x63   :  { %816 = vmatpush3.bf16.msra.mxu0 %v922_v11  ;;  %836 = vmatpush3.bf16.msra.mxu1 %v931_v16 }
  0x64   :  { %817 = vmatprep.subr.bf16.mxu0 %v1115_v0  ;;  %837 = vmatprep.subr.bf16.mxu1 %v1115_v0 }
  0x67   :  { %818 = vmatpush3.bf16.msra.mxu0 %v923_v13  ;;  %838 = vmatpush3.bf16.msra.mxu1 %v932_v17 }
  0x68   :  { %843 = vmatprep.subr.bf16.mxu0 %v1115_v0  ;;  %863 = vmatprep.subr.bf16.mxu1 %v1115_v0 }
  0x6a   :  { %820 = vmatmul.mubr.bf16.vlgmr.msra.gmra.mxu0 %v924_v14 }
  0x6b   :  { %859 = vmatprep.mubr.msk.bf16.mxu0 %vm1116_vm0, %v1115_v0  ;;  %844 = vmatpush3.bf16.msra.mxu0 %v933_v18 }
  0x6c   :  { %845 = vmatprep.subr.bf16.mxu0 %v1115_v0 }
  0x6f   :  { %846 = vmatpush3.bf16.msra.mxu0 %v934_v19 }
  0x70   :  { %847 = vmatprep.subr.bf16.mxu0 %v1115_v0 }
  0x73   :  { %848 = vmatpush3.bf16.msra.mxu0 %v935_v20 }
  0x74   :  { %849 = vmatprep.subr.bf16.mxu0 %v1115_v0 }
  0x77   :  { %850 = vmatpush3.bf16.msra.mxu0 %v936_v21 }
  0x78   :  { %851 = vmatprep.subr.bf16.mxu0 %v1115_v0 }
  0x7b   :  { %852 = vmatpush3.bf16.msra.mxu0 %v937_v22 }
  0x7c   :  { %853 = vmatprep.subr.bf16.mxu0 %v1115_v0 }
  0x7f   :  { %854 = vmatpush3.bf16.msra.mxu0 %v938_v33 }
  0x80   :  { %855 = vmatprep.subr.bf16.mxu0 %v1115_v0 }
  0x83   :  { %856 = vmatpush3.bf16.msra.mxu0 %v939_v34 }
  0x84   :  { %857 = vmatprep.subr.bf16.mxu0 %v1115_v0 }
  0x87   :  { %858 = vmatpush3.bf16.msra.mxu0 %v940_v35 }
  0x88   :  { %883 = vmatprep.subr.bf16.mxu0 %v1115_v0 }
 0x12a   :  { %v223_v24 = vpop.f32.mrf.mxu0 }
 0x12b   :  { %v224_v26 = vadd.f32 %v712_v23, %v223_v24 }
 0x12c   :  { %v821_v25 = vpop.f32.mrf.mxu0 }
 0x12d   :  { %v230_v30 = vmax.f32 %v224_v26, 0.0 }
 0x12e   :  { %v226_v27 = vpop.f32.mrf.mxu0 }
 0x12f   :  { %v227_v28 = vadd.f32 %v712_v23, %v226_v27 }
 0x130   :  { %v822_v29 = vpop.f32.mrf.mxu0 }
 0x131   :  { %v231_v31 = vmax.f32 %v227_v28, 0.0 }
 0x133   :  { %v232_v32 = vpack.c.bf16 %v231_v31, %v230_v30 }
 0x135   :  { %840 = vmatmul.mubr.bf16.vlgmr.msra.gmra.mxu1 %v232_v32 }
 0x136   :  { %879 = vmatprep.mubr.msk.bf16.mxu1 %vm1116_vm0, %v1115_v0  ;;  %864 = vmatpush3.bf16.msra.mxu1 %v941_v36 }
 0x137   :  { %865 = vmatprep.subr.bf16.mxu1 %v1115_v0 }
 0x13a   :  { %866 = vmatpush3.bf16.msra.mxu1 %v942_v37 }
 0x13b   :  { %867 = vmatprep.subr.bf16.mxu1 %v1115_v0 }
 0x13e   :  { %868 = vmatpush3.bf16.msra.mxu1 %v943_v38 }
 0x13f   :  { %869 = vmatprep.subr.bf16.mxu1 %v1115_v0 }
 0x142   :  { %870 = vmatpush3.bf16.msra.mxu1 %v944_v39 }
 0x143   :  { %871 = vmatprep.subr.bf16.mxu1 %v1115_v0 }
 0x146   :  { %872 = vmatpush3.bf16.msra.mxu1 %v945_v40 }
 0x147   :  { %873 = vmatprep.subr.bf16.mxu1 %v1115_v0 }
 0x14a   :  { %874 = vmatpush3.bf16.msra.mxu1 %v946_v51 }
 0x14b   :  { %875 = vmatprep.subr.bf16.mxu1 %v1115_v0 }
 0x14e   :  { %876 = vmatpush3.bf16.msra.mxu1 %v947_v52 }
 0x14f   :  { %877 = vmatprep.subr.bf16.mxu1 %v1115_v0 }
 0x152   :  { %878 = vmatpush3.bf16.msra.mxu1 %v948_v53 }
 0x1f5   :  { %v338_v42 = vpop.f32.mrf.mxu1 }
 0x1f6   :  { %v339_v44 = vadd.f32 %v722_v41, %v338_v42 }
 0x1f7   :  { %v841_v43 = vpop.f32.mrf.mxu1 }
 0x1f8   :  { %v345_v48 = vmax.f32 %v339_v44, 0.0 }
 0x1f9   :  { %v341_v45 = vpop.f32.mrf.mxu1 }
 0x1fa   :  { %v342_v46 = vadd.f32 %v722_v41, %v341_v45 }
 0x1fb   :  { %v842_v47 = vpop.f32.mrf.mxu1 }
 0x1fc   :  { %v346_v49 = vmax.f32 %v342_v46, 0.0 }
 0x1fe   :  { %v347_v50 = vpack.c.bf16 %v346_v49, %v345_v48 }
 0x200   :  { %860 = vmatmul.mubr.bf16.vlgmr.msra.gmra.mxu0 %v347_v50 }
 0x201   :  { %899 = vmatprep.mubr.msk.bf16.mxu0 %vm1116_vm0, %v1115_v0  ;;  %884 = vmatpush3.bf16.msra.mxu0 %v949_v54 }
 0x202   :  { %885 = vmatprep.subr.bf16.mxu0 %v1115_v0 }
 0x205   :  { %886 = vmatpush3.bf16.msra.mxu0 %v950_v55 }
 0x206   :  { %887 = vmatprep.subr.bf16.mxu0 %v1115_v0 }
 0x209   :  { %888 = vmatpush3.bf16.msra.mxu0 %v951_v56 }
 0x20a   :  { %889 = vmatprep.subr.bf16.mxu0 %v1115_v0 }
 0x20d   :  { %890 = vmatpush3.bf16.msra.mxu0 %v952_v57 }
 0x20e   :  { %891 = vmatprep.subr.bf16.mxu0 %v1115_v0 }
 0x211   :  { %892 = vmatpush3.bf16.msra.mxu0 %v953_v58 }
 0x212   :  { %893 = vmatprep.subr.bf16.mxu0 %v1115_v0 }
 0x215   :  { %894 = vmatpush3.bf16.msra.mxu0 %v954_v6 }
 0x216   :  { %895 = vmatprep.subr.bf16.mxu0 %v1115_v0 }
 0x219   :  { %896 = vmatpush3.bf16.msra.mxu0 %v955_v7 }
 0x21a   :  { %897 = vmatprep.subr.bf16.mxu0 %v1115_v0  ;;  %v749_v0 = vld [vmem:[%s1270_s6 + $0x4] ss:$0 sm:$0xff] }
 0x21d   :  { %898 = vmatpush3.bf16.msra.mxu0 %v956_v8 }
 0x2c0   :  { %v453_v60 = vpop.f32.mrf.mxu0 }
 0x2c1   :  { %v454_v62 = vadd.f32 %v731_v59, %v453_v60 }
 0x2c2   :  { %v861_v61 = vpop.f32.mrf.mxu0 }
 0x2c3   :  { %v460_v3 = vmax.f32 %v454_v62, 0.0 }
 0x2c4   :  { %v456_v63 = vpop.f32.mrf.mxu0 }
 0x2c5   :  { %v457_v1 = vadd.f32 %v731_v59, %v456_v63 }
 0x2c6   :  { %v862_v2 = vpop.f32.mrf.mxu0 }
 0x2c7   :  { %v461_v4 = vmax.f32 %v457_v1, 0.0 }
 0x2c9   :  { %v462_v5 = vpack.c.bf16 %v461_v4, %v460_v3 }
 0x2cb   :  { %880 = vmatmul.mubr.bf16.vlgmr.msra.gmra.mxu1 %v462_v5 }
 0x38b   :  { %v568_v10 = vpop.f32.mrf.mxu1 }
 0x38c   :  { %v569_v12 = vadd.f32 %v740_v9, %v568_v10 }
 0x38d   :  { %v881_v11 = vpop.f32.mrf.mxu1 }
 0x38e   :  { %v575_v16 = vmax.f32 %v569_v12, 0.0 }
 0x38f   :  { %v571_v13 = vpop.f32.mrf.mxu1 }
 0x390   :  { %v572_v14 = vadd.f32 %v740_v9, %v571_v13 }
 0x391   :  { %v882_v15 = vpop.f32.mrf.mxu1 }
 0x392   :  { %v576_v17 = vmax.f32 %v572_v14, 0.0 }
 0x394   :  { %v577_v18 = vpack.c.bf16 %v576_v17, %v575_v16 }
 0x396   :  { %900 = vmatmul.mubr.bf16.vlgmr.msra.gmra.mxu0 %v577_v18 }
 0x456   :  { %v683_v19 = vpop.f32.mrf.mxu0 }
 0x457   :  { %v684_v20 = vadd.f32 %v749_v0, %v683_v19 }
 0x458   :  { %v901_v21 = vpop.f32.mrf.mxu0 }
 0x459   :  { %690 = vst [vmem:[#allocation13] sm:$0xff] %v684_v20 }
 0x45a   :  { %v686_v22 = vpop.f32.mrf.mxu0 }
 0x45b   :  { %v687_v23 = vadd.f32 %v749_v0, %v686_v22 }
 0x45c   :  { %v902_v24 = vpop.f32.mrf.mxu0 }
 0x45d   :  { %691 = vst [vmem:[#allocation13 + $0x8] sm:$0xff] %v687_v23 }
 0x45e   :  { %1088 = shalt.err (!%p1085_p6)
}
 0x45f   :  { %s1118_s1 = smov 128   ;;  %s1119_s6 = smov 8  }
 0x460   :  { %703 = dma.vmem_to_hbm [thread:$0]  %s698_s15, 256, %s1271_s7, [#allocation4], %s1118_s1, %s1118_s1, %s1119_s6  }
 0x461   :  { %1105 = dma.done.wait [#allocation4], 256  }
 0x462   :  { %1106 = vsyncadd [#allocation4], 4294967040 }
 0x463   :  { %707 = vsyncpa [#allocation3], 1 }
 0x464   :  { %708 = vsyncpa [#allocation6], 1 }
 0x465   :  { %709 = vsyncpa [#allocation9], 1 }
 0x466   :  { %710 = vsyncpa [#allocation12], 1 }
 0x467   :  { %711 = vsyncpa [#allocation4], 1 }

// kernel: tpu_custom_call.1
= control target key start
LH: loop header
LB: loop body
LE: loop exit
PB: predicated region body
PF: predicated region fallthrough
CT: control target
= control target key end

     0   :  { %12 = vsyncpa [#allocation3], 0  ;;  %s1264_s0 = inlined_call_operand.hbm [shape: bf16[16,128], index: 0, kind: input, shape index: {}]   ;;  %s1265_s1 = inlined_call_operand.hbm [shape: bf16[128,128], index: 1, kind: input, shape index: {}]   ;;  %s1266_s2 = inlined_call_operand.hbm [shape: bf16[128,128], index: 2, kind: input, shape index: {}]   ;;  %s1267_s3 = inlined_call_operand.hbm [shape: bf16[128,128], index: 3, kind: input, shape index: {}]   ;;  %s1268_s4 = inlined_call_operand.hbm [shape: bf16[128,128], index: 4, kind: input, shape index: {}]   ;;  %s1269_s5 = inlined_call_operand.hbm [shape: bf16[128,128], index: 5, kind: input, shape index: {}]   ;;  %s1270_s6 = inlined_call_operand.vmem [shape: f32[1,640], index: 6, kind: input, shape index: {}]   ;;  %s1271_s7 = inlined_call_operand.hbm [shape: f32[16,128], index: 7, kind: output, shape index: {}]  }
   0x1   :  { %13 = vsyncpa [#allocation6], 0 }
   0x2   :  { %14 = vsyncpa [#allocation9], 0 }
   0x3   :  { %15 = vsyncpa [#allocation12], 0 }
   0x4   :  { %16 = vsyncpa [#allocation4], 0  ;;  %s1107_s24 = smov [#allocation5]   ;;  %s1108_s26 = smov [#allocation8]  }
   0x5   :  { %s34_s25 = sshll.u32 %s1107_s24, 4  ;;  %s58_s27 = sshll.u32 %s1108_s26, 4  ;;  %s35_s25 = int_to_ptr.vmem [resolvable:$true] %s34_s25  ;;  %s59_s27 = int_to_ptr.vmem [resolvable:$true] %s58_s27 }
   0x6   :  { %s965_s28 = scalar_lea.vmem %s35_s25, 1024  ;;  %p970_p1 = scmp.lt.s32.totalorder %s35_s25, %s35_s25 }
   0x7   :  { %p966_p0 = scmp.ne.s32.totalorder %s35_s25, %s965_s28  ;;  %p971_p2 = scmp.lt.s32.totalorder %s965_s28, %s965_s28 }
   0x9   :  { %p972_p3 = por %p971_p2, %p970_p1 }
   0xb   :  { %p973_p4 = pnand %p972_p3, %p966_p0 }
   0xd   :  { %976 = shalt.err (!%p973_p4)
}
   0xe   :  { %s1109_s29 = smov 64   ;;  %s1110_s30 = smov 4  }
   0xf   :  { %40 = dma.hbm_to_vmem [thread:$0]  %s1265_s1, 1024, %s35_s25, [#allocation6], %s1109_s29, %s1109_s29, %s1110_s30  }
  0x10   :  { %s985_s10 = scalar_lea.vmem %s59_s27, 1024  ;;  %p990_p6 = scmp.lt.s32.totalorder %s59_s27, %s59_s27 }
  0x11   :  { %p986_p5 = scmp.ne.s32.totalorder %s59_s27, %s985_s10  ;;  %p991_p7 = scmp.lt.s32.totalorder %s985_s10, %s985_s10 }
  0x13   :  { %p992_p8 = por %p991_p7, %p990_p6 }
  0x15   :  { %p993_p9 = pnand %p992_p8, %p986_p5 }
  0x17   :  { %996 = shalt.err (!%p993_p9)
}
  0x18   :  { %64 = dma.hbm_to_vmem [thread:$0]  %s1267_s3, 1024, %s59_s27, [#allocation9], %s1109_s29, %s1109_s29, %s1110_s30  }
  0x19   :  { %s1111_s13 = smov [#allocation2]   ;;  %s1112_s15 = smov [#allocation7]  }
  0x1a   :  { %s22_s14 = sshll.u32 %s1111_s13, 4  ;;  %s46_s16 = sshll.u32 %s1112_s15, 4  ;;  %s23_s14 = int_to_ptr.vmem [resolvable:$true] %s22_s14  ;;  %s47_s16 = int_to_ptr.vmem [resolvable:$true] %s46_s16 }
  0x1b   :  { %s1005_s1 = scalar_lea.vmem %s23_s14, 128  ;;  %p1010_p11 = scmp.lt.s32.totalorder %s23_s14, %s23_s14 }
  0x1c   :  { %p1006_p10 = scmp.ne.s32.totalorder %s23_s14, %s1005_s1  ;;  %p1011_p12 = scmp.lt.s32.totalorder %s1005_s1, %s1005_s1 }
  0x1e   :  { %p1012_p13 = por %p1011_p12, %p1010_p11 }
  0x20   :  { %p1013_p0 = pnand %p1012_p13, %p1006_p10 }
  0x22   :  { %1016 = shalt.err (!%p1013_p0)
}
  0x23   :  { %28 = dma.hbm_to_vmem [thread:$0]  %s1264_s0, 128, %s23_s14, [#allocation3], %s1109_s29, %s1109_s29, %s1110_s30  }
  0x24   :  { %s1025_s3 = scalar_lea.vmem %s47_s16, 1024  ;;  %p1030_p2 = scmp.lt.s32.totalorder %s47_s16, %s47_s16 }
  0x25   :  { %p1026_p1 = scmp.ne.s32.totalorder %s47_s16, %s1025_s3  ;;  %p1031_p3 = scmp.lt.s32.totalorder %s1025_s3, %s1025_s3 }
  0x27   :  { %p1032_p4 = por %p1031_p3, %p1030_p2 }
  0x29   :  { %p1033_p5 = pnand %p1032_p4, %p1026_p1 }
  0x2b   :  { %1036 = shalt.err (!%p1033_p5)
}
  0x2c   :  { %52 = dma.hbm_to_vmem [thread:$0]  %s1266_s2, 1024, %s47_s16, [#allocation6], %s1109_s29, %s1109_s29, %s1110_s30  }
  0x2d   :  { %s1113_s21 = smov [#allocation10]   ;;  %s1114_s23 = smov [#allocation11]  }
  0x2e   :  { %s70_s22 = sshll.u32 %s1113_s21, 4  ;;  %s82_s24 = sshll.u32 %s1114_s23, 4  ;;  %s71_s22 = int_to_ptr.vmem [resolvable:$true] %s70_s22  ;;  %s83_s24 = int_to_ptr.vmem [resolvable:$true] %s82_s24 }
  0x2f   :  { %s1045_s0 = scalar_lea.vmem %s71_s22, 1024  ;;  %p1050_p7 = scmp.lt.s32.totalorder %s71_s22, %s71_s22 }
  0x30   :  { %p1046_p6 = scmp.ne.s32.totalorder %s71_s22, %s1045_s0  ;;  %p1051_p8 = scmp.lt.s32.totalorder %s1045_s0, %s1045_s0 }
  0x32   :  { %p1052_p9 = por %p1051_p8, %p1050_p7 }
  0x34   :  { %p1053_p10 = pnand %p1052_p9, %p1046_p6 }
  0x36   :  { %1056 = shalt.err (!%p1053_p10)
}
  0x37   :  { %76 = dma.hbm_to_vmem [thread:$0]  %s1268_s4, 1024, %s71_s22, [#allocation9], %s1109_s29, %s1109_s29, %s1110_s30  }
  0x38   :  { %s1065_s2 = scalar_lea.vmem %s83_s24, 1024  ;;  %p1070_p12 = scmp.lt.s32.totalorder %s83_s24, %s83_s24 }
  0x39   :  { %p1066_p11 = scmp.ne.s32.totalorder %s83_s24, %s1065_s2  ;;  %p1071_p13 = scmp.lt.s32.totalorder %s1065_s2, %s1065_s2 }
  0x3b   :  { %p1072_p0 = por %p1071_p13, %p1070_p12 }
  0x3d   :  { %p1073_p1 = pnand %p1072_p0, %p1066_p11 }
  0x3f   :  { %1076 = shalt.err (!%p1073_p1)
}
  0x40   :  { %88 = dma.hbm_to_vmem [thread:$0]  %s1269_s5, 1024, %s83_s24, [#allocation12], %s1109_s29, %s1109_s29, %s1110_s30  }
  0x41   :  { %1097 = dma.done.wait [#allocation3], 128  }
  0x42   :  { %1098 = vsyncadd [#allocation3], 4294967168 }
  0x43   :  { %1099 = dma.done.wait [#allocation6], 2048  }
  0x44   :  { %1100 = vsyncadd [#allocation6], 4294965248 }
  0x45   :  { %1101 = dma.done.wait [#allocation9], 2048  }
  0x46   :  { %1102 = vsyncadd [#allocation9], 4294965248 }
  0x47   :  { %1103 = dma.done.wait [#allocation12], 1024  }
  0x48   :  { %1104 = vsyncadd [#allocation12], 4294966272  ;;  %v1115_v0 = vmov 0.0   ;;  %vm1116_vm0 = vmmov 0   ;;  %v916_v1 = vld [vmem:[#allocation5 + $0x38] sm:$0xff]   ;;  %v917_v2 = vld [vmem:[#allocation5 + $0x30] sm:$0xff]  }
  0x49   :  { %803 = vmatprep.subr.bf16.mxu0 %v1115_v0  ;;  %819 = vmatprep.mubr.msk.bf16.mxu0 %vm1116_vm0, %v1115_v0  ;;  %v918_v3 = vld [vmem:[#allocation5 + $0x28] sm:$0xff]   ;;  %v925_v4 = vld [vmem:[#allocation7 + $0x38] sm:$0xff]   ;;  %v919_v5 = vld [vmem:[#allocation5 + $0x20] sm:$0xff]   ;;  %s1117_s14 = smov [#allocation13]  }
  0x4a   :  { %823 = vmatprep.subr.bf16.mxu1 %v1115_v0  ;;  %839 = vmatprep.mubr.msk.bf16.mxu1 %vm1116_vm0, %v1115_v0  ;;  %v926_v6 = vld [vmem:[#allocation7 + $0x30] sm:$0xff]   ;;  %v920_v7 = vld [vmem:[#allocation5 + $0x18] sm:$0xff]   ;;  %v927_v8 = vld [vmem:[#allocation7 + $0x28] sm:$0xff]   ;;  %s697_s15 = sshll.u32 %s1117_s14, 4  ;;  %s698_s15 = int_to_ptr.vmem [resolvable:$true] %s697_s15 }
  0x4b   :  { %804 = vmatpush3.bf16.msra.mxu0 %v916_v1  ;;  %824 = vmatpush3.bf16.msra.mxu1 %v925_v4  ;;  %v921_v9 = vld [vmem:[#allocation5 + $0x10] sm:$0xff]   ;;  %v928_v10 = vld [vmem:[#allocation7 + $0x20] sm:$0xff]   ;;  %v922_v11 = vld [vmem:[#allocation5 + $0x8] sm:$0xff]   ;;  %s1077_s16 = scalar_lea.vmem %s698_s15, 256  ;;  %p1082_p3 = scmp.lt.s32.totalorder %s698_s15, %s698_s15 }
  0x4c   :  { %805 = vmatprep.subr.bf16.mxu0 %v1115_v0  ;;  %825 = vmatprep.subr.bf16.mxu1 %v1115_v0  ;;  %v929_v12 = vld [vmem:[#allocation7 + $0x18] sm:$0xff]   ;;  %v923_v13 = vld [vmem:[#allocation5] sm:$0xff]   ;;  %v930_v15 = vld [vmem:[#allocation7 + $0x10] sm:$0xff]   ;;  %p1078_p2 = scmp.ne.s32.totalorder %s698_s15, %s1077_s16  ;;  %p1083_p4 = scmp.lt.s32.totalorder %s1077_s16, %s1077_s16 }
  0x4d   :  { %v924_v14 = vld [vmem:[#allocation2] sm:$0xff]   ;;  %v931_v16 = vld [vmem:[#allocation7 + $0x8] sm:$0xff]   ;;  %v932_v17 = vld [vmem:[#allocation7] sm:$0xff]  }
  0x4e   :  { %v933_v18 = vld [vmem:[#allocation8 + $0x38] sm:$0xff]   ;;  %v934_v19 = vld [vmem:[#allocation8 + $0x30] sm:$0xff]   ;;  %v935_v20 = vld [vmem:[#allocation8 + $0x28] sm:$0xff]   ;;  %p1084_p5 = por %p1083_p4, %p1082_p3 }
  0x4f   :  { %806 = vmatpush3.bf16.msra.mxu0 %v917_v2  ;;  %826 = vmatpush3.bf16.msra.mxu1 %v926_v6  ;;  %v936_v21 = vld [vmem:[#allocation8 + $0x20] sm:$0xff]   ;;  %v937_v22 = vld [vmem:[#allocation8 + $0x18] sm:$0xff]   ;;  %v938_v33 = vld [vmem:[#allocation8 + $0x10] sm:$0xff]  }
  0x50   :  { %807 = vmatprep.subr.bf16.mxu0 %v1115_v0  ;;  %827 = vmatprep.subr.bf16.mxu1 %v1115_v0  ;;  %v712_v23 = vld [vmem:[%s1270_s6] ss:$0 sm:$0xff]  ;;  %v939_v34 = vld [vmem:[#allocation8 + $0x8] sm:$0xff]   ;;  %v940_v35 = vld [vmem:[#allocation8] sm:$0xff]   ;;  %p1085_p6 = pnand %p1084_p5, %p1078_p2 }
  0x51   :  { %v941_v36 = vld [vmem:[#allocation10 + $0x38] sm:$0xff]   ;;  %v942_v37 = vld [vmem:[#allocation10 + $0x30] sm:$0xff]   ;;  %v943_v38 = vld [vmem:[#allocation10 + $0x28] sm:$0xff]  }
  0x52   :  { %v944_v39 = vld [vmem:[#allocation10 + $0x20] sm:$0xff]   ;;  %v945_v40 = vld [vmem:[#allocation10 + $0x18] sm:$0xff]   ;;  %v946_v51 = vld [vmem:[#allocation10 + $0x10] sm:$0xff]  }
  0x53   :  { %808 = vmatpush3.bf16.msra.mxu0 %v918_v3  ;;  %828 = vmatpush3.bf16.msra.mxu1 %v927_v8  ;;  %v722_v41 = vld [vmem:[%s1270_s6 + $0x1] ss:$0 sm:$0xff]  ;;  %v947_v52 = vld [vmem:[#allocation10 + $0x8] sm:$0xff]   ;;  %v948_v53 = vld [vmem:[#allocation10] sm:$0xff]  }
  0x54   :  { %809 = vmatprep.subr.bf16.mxu0 %v1115_v0  ;;  %829 = vmatprep.subr.bf16.mxu1 %v1115_v0  ;;  %v949_v54 = vld [vmem:[#allocation11 + $0x38] sm:$0xff]   ;;  %v950_v55 = vld [vmem:[#allocation11 + $0x30] sm:$0xff]   ;;  %v951_v56 = vld [vmem:[#allocation11 + $0x28] sm:$0xff]  }
  0x55   :  { %v952_v57 = vld [vmem:[#allocation11 + $0x20] sm:$0xff]   ;;  %v953_v58 = vld [vmem:[#allocation11 + $0x18] sm:$0xff]   ;;  %v954_v6 = vld [vmem:[#allocation11 + $0x10] sm:$0xff]  }
  0x56   :  { %v731_v59 = vld [vmem:[%s1270_s6 + $0x2] ss:$0 sm:$0xff]  ;;  %v956_v8 = vld [vmem:[#allocation11] sm:$0xff]  }
  0x57   :  { %810 = vmatpush3.bf16.msra.mxu0 %v919_v5  ;;  %830 = vmatpush3.bf16.msra.mxu1 %v928_v10 }
  0x58   :  { %811 = vmatprep.subr.bf16.mxu0 %v1115_v0  ;;  %831 = vmatprep.subr.bf16.mxu1 %v1115_v0 }
  0x5b   :  { %812 = vmatpush3.bf16.msra.mxu0 %v920_v7  ;;  %832 = vmatpush3.bf16.msra.mxu1 %v929_v12  ;;  %v955_v7 = vld [vmem:[#allocation11 + $0x8] sm:$0xff]  }
  0x5c   :  { %813 = vmatprep.subr.bf16.mxu0 %v1115_v0  ;;  %833 = vmatprep.subr.bf16.mxu1 %v1115_v0 }
  0x5f   :  { %814 = vmatpush3.bf16.msra.mxu0 %v921_v9  ;;  %834 = vmatpush3.bf16.msra.mxu1 %v930_v15  ;;  %v740_v9 = vld [vmem:[%s1270_s6 + $0x3] ss:$0 sm:$0xff] }
  0x60   :  { %815 = vmatprep.subr.bf16.mxu0 %v1115_v0  ;;  %835 = vmatprep.subr.bf16.mxu1 %v1115_v0 }
  0x63   :  { %816 = vmatpush3.bf16.msra.mxu0 %v922_v11  ;;  %836 = vmatpush3.bf16.msra.mxu1 %v931_v16 }
  0x64   :  { %817 = vmatprep.subr.bf16.mxu0 %v1115_v0  ;;  %837 = vmatprep.subr.bf16.mxu1 %v1115_v0 }
  0x67   :  { %818 = vmatpush3.bf16.msra.mxu0 %v923_v13  ;;  %838 = vmatpush3.bf16.msra.mxu1 %v932_v17 }
  0x68   :  { %843 = vmatprep.subr.bf16.mxu0 %v1115_v0  ;;  %863 = vmatprep.subr.bf16.mxu1 %v1115_v0 }
  0x6a   :  { %820 = vmatmul.mubr.bf16.vlgmr.msra.gmra.mxu0 %v924_v14 }
  0x6b   :  { %859 = vmatprep.mubr.msk.bf16.mxu0 %vm1116_vm0, %v1115_v0  ;;  %844 = vmatpush3.bf16.msra.mxu0 %v933_v18 }
  0x6c   :  { %845 = vmatprep.subr.bf16.mxu0 %v1115_v0 }
  0x6f   :  { %846 = vmatpush3.bf16.msra.mxu0 %v934_v19 }
  0x70   :  { %847 = vmatprep.subr.bf16.mxu0 %v1115_v0 }
  0x73   :  { %848 = vmatpush3.bf16.msra.mxu0 %v935_v20 }
  0x74   :  { %849 = vmatprep.subr.bf16.mxu0 %v1115_v0 }
  0x77   :  { %850 = vmatpush3.bf16.msra.mxu0 %v936_v21 }
  0x78   :  { %851 = vmatprep.subr.bf16.mxu0 %v1115_v0 }
  0x7b   :  { %852 = vmatpush3.bf16.msra.mxu0 %v937_v22 }
  0x7c   :  { %853 = vmatprep.subr.bf16.mxu0 %v1115_v0 }
  0x7f   :  { %854 = vmatpush3.bf16.msra.mxu0 %v938_v33 }
  0x80   :  { %855 = vmatprep.subr.bf16.mxu0 %v1115_v0 }
  0x83   :  { %856 = vmatpush3.bf16.msra.mxu0 %v939_v34 }
  0x84   :  { %857 = vmatprep.subr.bf16.mxu0 %v1115_v0 }
  0x87   :  { %858 = vmatpush3.bf16.msra.mxu0 %v940_v35 }
  0x88   :  { %883 = vmatprep.subr.bf16.mxu0 %v1115_v0 }
 0x12a   :  { %v223_v24 = vpop.f32.mrf.mxu0 }
 0x12b   :  { %v224_v26 = vadd.f32 %v712_v23, %v223_v24 }
 0x12c   :  { %v821_v25 = vpop.f32.mrf.mxu0 }
 0x12d   :  { %v230_v30 = vmax.f32 %v224_v26, 0.0 }
 0x12e   :  { %v226_v27 = vpop.f32.mrf.mxu0 }
 0x12f   :  { %v227_v28 = vadd.f32 %v712_v23, %v226_v27 }
 0x130   :  { %v822_v29 = vpop.f32.mrf.mxu0 }
 0x131   :  { %v231_v31 = vmax.f32 %v227_v28, 0.0 }
 0x133   :  { %v232_v32 = vpack.c.bf16 %v231_v31, %v230_v30 }
 0x135   :  { %840 = vmatmul.mubr.bf16.vlgmr.msra.gmra.mxu1 %v232_v32 }
 0x136   :  { %879 = vmatprep.mubr.msk.bf16.mxu1 %vm1116_vm0, %v1115_v0  ;;  %864 = vmatpush3.bf16.msra.mxu1 %v941_v36 }
 0x137   :  { %865 = vmatprep.subr.bf16.mxu1 %v1115_v0 }
 0x13a   :  { %866 = vmatpush3.bf16.msra.mxu1 %v942_v37 }
 0x13b   :  { %867 = vmatprep.subr.bf16.mxu1 %v1115_v0 }
 0x13e   :  { %868 = vmatpush3.bf16.msra.mxu1 %v943_v38 }
 0x13f   :  { %869 = vmatprep.subr.bf16.mxu1 %v1115_v0 }
 0x142   :  { %870 = vmatpush3.bf16.msra.mxu1 %v944_v39 }
 0x143   :  { %871 = vmatprep.subr.bf16.mxu1 %v1115_v0 }
 0x146   :  { %872 = vmatpush3.bf16.msra.mxu1 %v945_v40 }
 0x147   :  { %873 = vmatprep.subr.bf16.mxu1 %v1115_v0 }
 0x14a   :  { %874 = vmatpush3.bf16.msra.mxu1 %v946_v51 }
 0x14b   :  { %875 = vmatprep.subr.bf16.mxu1 %v1115_v0 }
 0x14e   :  { %876 = vmatpush3.bf16.msra.mxu1 %v947_v52 }
 0x14f   :  { %877 = vmatprep.subr.bf16.mxu1 %v1115_v0 }
 0x152   :  { %878 = vmatpush3.bf16.msra.mxu1 %v948_v53 }
 0x1f5   :  { %v338_v42 = vpop.f32.mrf.mxu1 }
 0x1f6   :  { %v339_v44 = vadd.f32 %v722_v41, %v338_v42 }
 0x1f7   :  { %v841_v43 = vpop.f32.mrf.mxu1 }
 0x1f8   :  { %v345_v48 = vmax.f32 %v339_v44, 0.0 }
 0x1f9   :  { %v341_v45 = vpop.f32.mrf.mxu1 }
 0x1fa   :  { %v342_v46 = vadd.f32 %v722_v41, %v341_v45 }
 0x1fb   :  { %v842_v47 = vpop.f32.mrf.mxu1 }
 0x1fc   :  { %v346_v49 = vmax.f32 %v342_v46, 0.0 }
 0x1fe   :  { %v347_v50 = vpack.c.bf16 %v346_v49, %v345_v48 }
 0x200   :  { %860 = vmatmul.mubr.bf16.vlgmr.msra.gmra.mxu0 %v347_v50 }
 0x201   :  { %899 = vmatprep.mubr.msk.bf16.mxu0 %vm1116_vm0, %v1115_v0  ;;  %884 = vmatpush3.bf16.msra.mxu0 %v949_v54 }
 0x202   :  { %885 = vmatprep.subr.bf16.mxu0 %v1115_v0 }
 0x205   :  { %886 = vmatpush3.bf16.msra.mxu0 %v950_v55 }
 0x206   :  { %887 = vmatprep.subr.bf16.mxu0 %v1115_v0 }
 0x209   :  { %888 = vmatpush3.bf16.msra.mxu0 %v951_v56 }
 0x20a   :  { %889 = vmatprep.subr.bf16.mxu0 %v1115_v0 }
 0x20d   :  { %890 = vmatpush3.bf16.msra.mxu0 %v952_v57 }
 0x20e   :  { %891 = vmatprep.subr.bf16.mxu0 %v1115_v0 }
 0x211   :  { %892 = vmatpush3.bf16.msra.mxu0 %v953_v58 }
 0x212   :  { %893 = vmatprep.subr.bf16.mxu0 %v1115_v0 }
 0x215   :  { %894 = vmatpush3.bf16.msra.mxu0 %v954_v6 }
 0x216   :  { %895 = vmatprep.subr.bf16.mxu0 %v1115_v0 }
 0x219   :  { %896 = vmatpush3.bf16.msra.mxu0 %v955_v7 }
 0x21a   :  { %897 = vmatprep.subr.bf16.mxu0 %v1115_v0  ;;  %v749_v0 = vld [vmem:[%s1270_s6 + $0x4] ss:$0 sm:$0xff] }
 0x21d   :  { %898 = vmatpush3.bf16.msra.mxu0 %v956_v8 }
 0x2c0   :  { %v453_v60 = vpop.f32.mrf.mxu0 }
 0x2c1   :  { %v454_v62 = vadd.f32 %v731_v59, %v453_v60 }
 0x2c2   :  { %v861_v61 = vpop.f32.mrf.mxu0 }
 0x2c3   :  { %v460_v3 = vmax.f32 %v454_v62, 0.0 }
 0x2c4   :  { %v456_v63 = vpop.f32.mrf.mxu0 }
 0x2c5   :  { %v457_v1 = vadd.f32 %v731_v59, %v456_v63 }
 0x2c6   :  { %v862_v2 = vpop.f32.mrf.mxu0 }
 0x2c7   :  { %v461_v4 = vmax.f32 %v457_v1, 0.0 }
 0x2c9   :  { %v462_v5 = vpack.c.bf16 %v461_v4, %v460_v3 }
 0x2cb   :  { %880 = vmatmul.mubr.bf16.vlgmr.msra.gmra.mxu1 %v462_v5 }
 0x38b   :  { %v568_v10 = vpop.f32.mrf.mxu1 }
 0x38c   :  { %v569_v12 = vadd.f32 %v740_v9, %v568_v10 }
 0x38d   :  { %v881_v11 = vpop.f32.mrf.mxu1 }
 0x38e   :  { %v575_v16 = vmax.f32 %v569_v12, 0.0 }
 0x38f   :  { %v571_v13 = vpop.f32.mrf.mxu1 }
 0x390   :  { %v572_v14 = vadd.f32 %v740_v9, %v571_v13 }
 0x391   :  { %v882_v15 = vpop.f32.mrf.mxu1 }
 0x392   :  { %v576_v17 = vmax.f32 %v572_v14, 0.0 }
 0x394   :  { %v577_v18 = vpack.c.bf16 %v576_v17, %v575_v16 }
 0x396   :  { %900 = vmatmul.mubr.bf16.vlgmr.msra.gmra.mxu0 %v577_v18 }
 0x456   :  { %v683_v19 = vpop.f32.mrf.mxu0 }
 0x457   :  { %v684_v20 = vadd.f32 %v749_v0, %v683_v19 }
 0x458   :  { %v901_v21 = vpop.f32.mrf.mxu0 }
 0x459   :  { %690 = vst [vmem:[#allocation13] sm:$0xff] %v684_v20 }
 0x45a   :  { %v686_v22 = vpop.f32.mrf.mxu0 }
 0x45b   :  { %v687_v23 = vadd.f32 %v749_v0, %v686_v22 }
 0x45c   :  { %v902_v24 = vpop.f32.mrf.mxu0 }
 0x45d   :  { %691 = vst [vmem:[#allocation13 + $0x8] sm:$0xff] %v687_v23 }
 0x45e   :  { %1088 = shalt.err (!%p1085_p6)
}
 0x45f   :  { %s1118_s1 = smov 128   ;;  %s1119_s6 = smov 8  }
 0x460   :  { %703 = dma.vmem_to_hbm [thread:$0]  %s698_s15, 256, %s1271_s7, [#allocation4], %s1118_s1, %s1118_s1, %s1119_s6  }
 0x461   :  { %1105 = dma.done.wait [#allocation4], 256  }
 0x462   :  { %1106 = vsyncadd [#allocation4], 4294967040 }
 0x463   :  { %707 = vsyncpa [#allocation3], 1 }
 0x464   :  { %708 = vsyncpa [#allocation6], 1 }
 0x465   :  { %709 = vsyncpa [#allocation9], 1 }
 0x466   :  { %710 = vsyncpa [#allocation12], 1 }
 0x467   :  { %711 = vsyncpa [#allocation4], 1 }

</bundles_post_ra>
